<compile_context>
chip_gen: v6e
topology: v6e:2x2x1
jax: 0.10.0
libtpu: 0.0.40
codegen_flags: <defaults>
</compile_context>

<pallas_src>
import functools

import jax
import jax.numpy as jnp
from jax.experimental import pallas as pl
from jax.experimental.pallas import tpu as pltpu


def _mmd_imq_kernel(w_ref, out_ref, *, n, zdim, pz_scale, scales):
    # w_ref: (2N, ZDIM) VMEM tile holding [z; e] stacked along rows.
    # out_ref: (1, 1) SMEM scalar.
    w = w_ref[...].astype(jnp.float32)
    m = 2 * n
    nf = float(n)

    # Single fused Gram matmul on the MXU; contraction on the feature axis,
    # no materialized transpose of the operand.
    gram = jax.lax.dot_general(
        w, w,
        dimension_numbers=(((1,), (1,)), ((), ())),
        preferred_element_type=jnp.float32,
    )  # (2N, 2N): [zz^T  ze^T; ez^T  ee^T]

    row = jax.lax.broadcasted_iota(jnp.int32, (m, m), 0)
    col = jax.lax.broadcasted_iota(jnp.int32, (m, m), 1)
    is_diag = row == col

    # Squared norms read off the Gram diagonal (exact), as a column and a row
    # vector, without an explicit transpose.
    gd = jnp.where(is_diag, gram, 0.0)
    diag_col = jnp.sum(gd, axis=1, keepdims=True)  # (2N, 1)
    diag_row = jnp.sum(gd, axis=0, keepdims=True)  # (1, 2N)

    # Pairwise squared distances of the stacked samples.
    d = diag_col + diag_row - 2.0 * gram
    d = jnp.maximum(d, 0.0)  # guard against fp cancellation going negative
    # Poison the main diagonal once so C/(C+d) ~ 0 there for every scale
    # (replaces the per-scale (1 - eye) mask multiplies).
    d = jnp.where(is_diag, jnp.float32(1e30), d)

    # Accumulate the IMQ kernel over the 7 scales: pure elementwise work,
    # no per-scale cross-lane reductions.
    sigma2_p = float(pz_scale) * float(pz_scale)
    c_base = 2.0 * float(zdim) * sigma2_p
    acc = jnp.zeros((m, m), jnp.float32)
    for scale in scales:
        c = jnp.float32(c_base * scale)
        acc = acc + c * pl.reciprocal(c + d, approx=False)

    # Scale-independent unbiased-estimator weights, applied once:
    #   same-half blocks (qq / pp, off-diagonal): +1/(n^2 - n)
    #   cross blocks (qp and pq):                 -1/n^2   (covers the 2x)
    same_half = (row < n) == (col < n)
    wgt = jnp.where(
        same_half,
        jnp.float32(1.0 / (nf * nf - nf)),
        jnp.float32(-1.0 / (nf * nf)),
    )

    # Single final reduction.
    out_ref[0, 0] = jnp.sum(acc * wgt)
    # TODO(synk): RBF variant needs torch.topk (k-th largest distance) to pick
    # sigma2_k; no clean in-kernel top-k primitive, so only IMQ is implemented.


def mmd_penalty(z, e, opts):
    """Pallas-backed IMQ MMD penalty. z, e: (N, ZDIM)."""
    assert z.shape == e.shape and z.ndim == 2
    n, zdim = z.shape
    # Stack once in the wrapper so the kernel does a single fused Gram matmul.
    w = jnp.concatenate(
        [z.astype(jnp.float32), e.astype(jnp.float32)], axis=0
    )  # (2N, ZDIM)

    kernel = functools.partial(
        _mmd_imq_kernel,
        n=n,
        zdim=opts.get("zdim", zdim),
        pz_scale=opts.get("pz_scale", 1.0),
        scales=(0.1, 0.2, 0.5, 1.0, 2.0, 5.0, 10.0),
    )
    out = pl.pallas_call(
        kernel,
        out_shape=jax.ShapeDtypeStruct((1, 1), jnp.float32),
        grid_spec=pltpu.PrefetchScalarGridSpec(
            num_scalar_prefetch=0,
            grid=(1,),
            in_specs=[pl.BlockSpec((2 * n, zdim), lambda i: (0, 0))],
            out_specs=pl.BlockSpec(memory_space=pltpu.MemorySpace.SMEM),
        ),
        compiler_params=pltpu.CompilerParams(
            dimension_semantics=("arbitrary",),
        ),
    )(w)
    return out[0, 0]


class Latent:
    """JAX/Pallas port of model/latent/mmd_latent.py::Latent."""

    def __init__(self, opts, **kwargs):
        self.opts = opts

    def forward(self, data, **kwargs):
        data["mmd_loss"] = mmd_penalty(data["z"], data["e"], self.opts)
        return data

    __call__ = forward


def _mmd_penalty_ref(z, e, opts):
    """Pure-JAX reference of the IMQ WAE mmd_penalty for verification."""
    n, zdim = z.shape
    nf = float(n)
    z = z.astype(jnp.float32)
    e = e.astype(jnp.float32)
    nq = jnp.sum(z * z, axis=1, keepdims=True)
    npz = jnp.sum(e * e, axis=1, keepdims=True)
    d_qq = nq + nq.T - 2.0 * (z @ z.T)
    d_pp = npz + npz.T - 2.0 * (e @ e.T)
    d_qp = nq + npz.T - 2.0 * (z @ e.T)
    mask = 1.0 - jnp.eye(n, dtype=jnp.float32)
    c_base = 2.0 * opts.get("zdim", zdim) * opts.get("pz_scale", 1.0) ** 2
    stat = 0.0
    for scale in (0.1, 0.2, 0.5, 1.0, 2.0, 5.0, 10.0):
        C = c_base * scale
        res1 = C / (C + d_qq) + C / (C + d_pp)
        res1 = jnp.sum(res1 * mask) / (nf * nf - nf)
        res2 = jnp.sum(C / (C + d_qp)) * 2.0 / (nf * nf)
        stat = stat + res1 - res2
    return stat


if __name__ == "__main__":
    key = jax.random.PRNGKey(0)
    kz, ke = jax.random.split(key)

    N, ZDIM = 8, 32
    opts = {"mmd_kernel": "IMQ", "zdim": ZDIM, "pz_scale": 1.0}

    z = jax.random.normal(kz, (N, ZDIM), dtype=jnp.float32)
    e = jax.random.normal(ke, (N, ZDIM), dtype=jnp.float32)

    latent = Latent(opts)
    data = {"z": z, "e": e}
    data = latent(data)
    loss = jax.block_until_ready(data["mmd_loss"])

    ref = jax.block_until_ready(_mmd_penalty_ref(z, e, opts))
    # Tolerance slightly looser than before: the fused-across-scales
    # accumulation and diagonal-poisoning reorder the f32 summations.
    assert jnp.allclose(loss, ref, atol=1e-4, rtol=1e-4), (loss, ref)

    print("KERNEL_OK")
</pallas_src>

<mosaic_0001>
module attributes {stable_mosaic.version = 11 : i64} {
  func.func @_mmd_imq_kernel(%arg0: i32, %arg1: memref<16x32xf32, #tpu.memory_space<vmem>>, %arg2: memref<1x1xf32, #tpu.memory_space<smem>>) attributes {dimension_semantics = [#tpu.dimension_semantics<arbitrary>], iteration_bounds = array<i64: 1>, scalar_prefetch = 0 : i64, scratch_operands = 0 : i64, tpu.core_type = #tpu.core_type<tc>, window_params = [{pipeline_mode = #tpu.pipeline_mode<synchronous>, transform_indices = @transform_0, window_bounds = array<i64: 16, 32>}, {transform_indices = @transform_1, window_bounds = array<i64: 1, 1>}]} {
    %c0 = arith.constant 0 : index
    %c0_0 = arith.constant 0 : index
    %0 = vector.load %arg1[%c0, %c0_0] : memref<16x32xf32, #tpu.memory_space<vmem>>, vector<16x32xf32>
    %cst = arith.constant dense<0.000000e+00> : vector<16x16xf32>
    %1 = tpu.matmul %0, %0, %cst {dimension_numbers = #tpu.dot_dimension_numbers<[1], [1], [0], [0], [0, 0, 1, 0], [], []>} : vector<16x32xf32>, vector<16x32xf32>, vector<16x16xf32> -> vector<16x16xf32>
    %2 = tpu.iota {dimensions = array<i32: 0>} : vector<16x16xi32>
    %3 = tpu.iota {dimensions = array<i32: 1>} : vector<16x16xi32>
    %4 = arith.cmpi eq, %2, %3 : vector<16x16xi32>
    %cst_1 = arith.constant 0.000000e+00 : f32
    %5 = vector.broadcast %cst_1 : f32 to vector<16x16xf32>
    %6 = arith.select %4, %1, %5 : vector<16x16xi1>, vector<16x16xf32>
    %cst_2 = arith.constant dense<0.000000e+00> : vector<16xf32>
    %7 = vector.multi_reduction <add>, %6, %cst_2 [1] : vector<16x16xf32> to vector<16xf32>
    %8 = vector.shape_cast %7 : vector<16xf32> to vector<16x1xf32>
    %cst_3 = arith.constant dense<0.000000e+00> : vector<16xf32>
    %9 = vector.multi_reduction <add>, %6, %cst_3 [0] : vector<16x16xf32> to vector<16xf32>
    %10 = vector.shape_cast %9 : vector<16xf32> to vector<1x16xf32>
    %11 = vector.broadcast %8 : vector<16x1xf32> to vector<16x16xf32>
    %12 = vector.broadcast %10 : vector<1x16xf32> to vector<16x16xf32>
    %13 = arith.addf %11, %12 : vector<16x16xf32>
    %cst_4 = arith.constant 2.000000e+00 : f32
    %14 = vector.broadcast %cst_4 : f32 to vector<16x16xf32>
    %15 = arith.mulf %14, %1 : vector<16x16xf32>
    %16 = arith.subf %13, %15 : vector<16x16xf32>
    %cst_5 = arith.constant 0.000000e+00 : f32
    %17 = vector.broadcast %cst_5 : f32 to vector<16x16xf32>
    %18 = arith.maximumf %16, %17 : vector<16x16xf32>
    %cst_6 = arith.constant 1.000000e+30 : f32
    %19 = vector.broadcast %cst_6 : f32 to vector<16x16xf32>
    %20 = arith.select %4, %19, %18 : vector<16x16xi1>, vector<16x16xf32>
    %cst_7 = arith.constant 0.000000e+00 : f32
    %21 = vector.broadcast %cst_7 : f32 to vector<16x16xf32>
    %cst_8 = arith.constant 6.400000e+00 : f32
    %22 = vector.broadcast %cst_8 : f32 to vector<16x16xf32>
    %23 = arith.addf %22, %20 : vector<16x16xf32>
    %24 = tpu.reciprocal %23 : vector<16x16xf32> -> vector<16x16xf32>
    %cst_9 = arith.constant 6.400000e+00 : f32
    %25 = vector.broadcast %cst_9 : f32 to vector<16x16xf32>
    %26 = arith.mulf %25, %24 : vector<16x16xf32>
    %27 = arith.addf %21, %26 : vector<16x16xf32>
    %cst_10 = arith.constant 1.280000e+01 : f32
    %28 = vector.broadcast %cst_10 : f32 to vector<16x16xf32>
    %29 = arith.addf %28, %20 : vector<16x16xf32>
    %30 = tpu.reciprocal %29 : vector<16x16xf32> -> vector<16x16xf32>
    %cst_11 = arith.constant 1.280000e+01 : f32
    %31 = vector.broadcast %cst_11 : f32 to vector<16x16xf32>
    %32 = arith.mulf %31, %30 : vector<16x16xf32>
    %33 = arith.addf %27, %32 : vector<16x16xf32>
    %cst_12 = arith.constant 3.200000e+01 : f32
    %34 = vector.broadcast %cst_12 : f32 to vector<16x16xf32>
    %35 = arith.addf %34, %20 : vector<16x16xf32>
    %36 = tpu.reciprocal %35 : vector<16x16xf32> -> vector<16x16xf32>
    %cst_13 = arith.constant 3.200000e+01 : f32
    %37 = vector.broadcast %cst_13 : f32 to vector<16x16xf32>
    %38 = arith.mulf %37, %36 : vector<16x16xf32>
    %39 = arith.addf %33, %38 : vector<16x16xf32>
    %cst_14 = arith.constant 6.400000e+01 : f32
    %40 = vector.broadcast %cst_14 : f32 to vector<16x16xf32>
    %41 = arith.addf %40, %20 : vector<16x16xf32>
    %42 = tpu.reciprocal %41 : vector<16x16xf32> -> vector<16x16xf32>
    %cst_15 = arith.constant 6.400000e+01 : f32
    %43 = vector.broadcast %cst_15 : f32 to vector<16x16xf32>
    %44 = arith.mulf %43, %42 : vector<16x16xf32>
    %45 = arith.addf %39, %44 : vector<16x16xf32>
    %cst_16 = arith.constant 1.280000e+02 : f32
    %46 = vector.broadcast %cst_16 : f32 to vector<16x16xf32>
    %47 = arith.addf %46, %20 : vector<16x16xf32>
    %48 = tpu.reciprocal %47 : vector<16x16xf32> -> vector<16x16xf32>
    %cst_17 = arith.constant 1.280000e+02 : f32
    %49 = vector.broadcast %cst_17 : f32 to vector<16x16xf32>
    %50 = arith.mulf %49, %48 : vector<16x16xf32>
    %51 = arith.addf %45, %50 : vector<16x16xf32>
    %cst_18 = arith.constant 3.200000e+02 : f32
    %52 = vector.broadcast %cst_18 : f32 to vector<16x16xf32>
    %53 = arith.addf %52, %20 : vector<16x16xf32>
    %54 = tpu.reciprocal %53 : vector<16x16xf32> -> vector<16x16xf32>
    %cst_19 = arith.constant 3.200000e+02 : f32
    %55 = vector.broadcast %cst_19 : f32 to vector<16x16xf32>
    %56 = arith.mulf %55, %54 : vector<16x16xf32>
    %57 = arith.addf %51, %56 : vector<16x16xf32>
    %cst_20 = arith.constant 6.400000e+02 : f32
    %58 = vector.broadcast %cst_20 : f32 to vector<16x16xf32>
    %59 = arith.addf %58, %20 : vector<16x16xf32>
    %60 = tpu.reciprocal %59 : vector<16x16xf32> -> vector<16x16xf32>
    %cst_21 = arith.constant 6.400000e+02 : f32
    %61 = vector.broadcast %cst_21 : f32 to vector<16x16xf32>
    %62 = arith.mulf %61, %60 : vector<16x16xf32>
    %63 = arith.addf %57, %62 : vector<16x16xf32>
    %c8_i32 = arith.constant 8 : i32
    %64 = vector.broadcast %c8_i32 : i32 to vector<16x16xi32>
    %65 = arith.cmpi slt, %2, %64 : vector<16x16xi32>
    %c8_i32_22 = arith.constant 8 : i32
    %66 = vector.broadcast %c8_i32_22 : i32 to vector<16x16xi32>
    %67 = arith.cmpi slt, %3, %66 : vector<16x16xi32>
    %68 = arith.xori %65, %67 : vector<16x16xi1>
    %cst_23 = arith.constant dense<true> : vector<16x16xi1>
    %69 = arith.xori %68, %cst_23 : vector<16x16xi1>
    %cst_24 = arith.constant 0.0178571437 : f32
    %cst_25 = arith.constant -1.562500e-02 : f32
    %70 = vector.broadcast %cst_24 : f32 to vector<16x16xf32>
    %71 = vector.broadcast %cst_25 : f32 to vector<16x16xf32>
    %72 = arith.select %69, %70, %71 : vector<16x16xi1>, vector<16x16xf32>
    %73 = arith.mulf %63, %72 : vector<16x16xf32>
    %74 = vector.shape_cast %73 : vector<16x16xf32> to vector<1x16x16xf32>
    %cst_26 = arith.constant dense<0.000000e+00> : vector<1xf32>
    %75 = vector.multi_reduction <add>, %74, %cst_26 [1, 2] : vector<1x16x16xf32> to vector<1xf32>
    %76 = vector.shape_cast %75 : vector<1xf32> to vector<1x1x1xf32>
    %77 = vector.extract %76[0, 0, 0] : f32 from vector<1x1x1xf32>
    %c0_27 = arith.constant 0 : index
    %c0_28 = arith.constant 0 : index
    %78 = memref.load %arg2[%c0_27, %c0_28] : memref<1x1xf32, #tpu.memory_space<smem>>
    memref.store %77, %arg2[%c0_27, %c0_28] : memref<1x1xf32, #tpu.memory_space<smem>>
    return
  }
  func.func @transform_0(%arg0: i32) -> (i32, i32) {
    %c0_i32 = arith.constant 0 : i32
    %c0_i32_0 = arith.constant 0 : i32
    %c0_i32_1 = arith.constant 0 : i32
    return %c0_i32, %c0_i32_0 : i32, i32
  }
  func.func @transform_1(%arg0: i32) -> (i32, i32) {
    %c0_i32 = arith.constant 0 : i32
    %c0_i32_0 = arith.constant 0 : i32
    %c0_i32_1 = arith.constant 0 : i32
    return %c0_i32, %c0_i32_0 : i32, i32
  }
}

</mosaic_0001>

<bundles_post_ra>
// kernel: tpu_custom_call.1
= control target key start
LH: loop header
LB: loop body
LE: loop exit
PB: predicated region body
PF: predicated region fallthrough
CT: control target
= control target key end

     0   :  { %6 = vsyncpa [#allocation3], 0  ;;  %s364_s0 = inlined_call_operand.hbm [shape: f32[16,32], index: 0, kind: input, shape index: {}]   ;;  %s365_s1 = inlined_call_operand.hbm [shape: f32[1,1], index: 1, kind: output, shape index: {}]  }
   0x1   :  { %7 = vsyncpa [#allocation4], 0  ;;  %s318_s6 = smov [#allocation2]  }
   0x2   :  { %s13_s7 = sshll.u32 %s318_s6, 4  ;;  %s14_s7 = int_to_ptr.vmem [resolvable:$true] %s13_s7 }
   0x3   :  { %s294_s8 = scalar_lea.vmem %s14_s7, 256  ;;  %p299_p1 = scmp.lt.s32.totalorder %s14_s7, %s14_s7 }
   0x4   :  { %p295_p0 = scmp.ne.s32.totalorder %s14_s7, %s294_s8  ;;  %p300_p2 = scmp.lt.s32.totalorder %s294_s8, %s294_s8 }
   0x6   :  { %p301_p3 = por %p300_p2, %p299_p1 }
   0x8   :  { %p302_p4 = pnand %p301_p3, %p295_p0 }
   0xa   :  { %305 = shalt.err (!%p302_p4)
}
   0xb   :  { %s319_s9 = smov 128   ;;  %s320_s10 = smov 8  }
   0xc   :  { %19 = dma.hbm_to_vmem [thread:$0]  %s364_s0, 256, %s14_s7, [#allocation3], %s319_s9, %s319_s9, %s320_s10  }
   0xd   :  { %314 = dma.done.wait [#allocation3], 256  }
   0xe   :  { %315 = vsyncadd [#allocation3], 4294967040  ;;  %vm25_vm0 = vcmask 261120   ;;  %v24_v0 = vld [vmem:[#allocation2 + $0x8] sm:$0xff]  ;;  %v23_v1 = vld [vmem:[#allocation2] sm:$0xff]  ;;  %v107_v2 = vlaneseq  ;;  %vm116_vm3 = vcmask 130048  }
   0xf   :  { %243 = vmatprep.subr.msk.mxu0 %vm25_vm0, %v24_v0  ;;  %247 = vmatprep.mubr.msk.f32.mxu0 %vm25_vm0, %v23_v1  ;;  %vm321_vm5 = vmmov 1   ;;  %s323_s13 = smov [#allocation5]  }
  0x10   :  { %244 = vmatpush3.xpose.msk.msra.mxu0 %vm25_vm0, %v24_v0  ;;  %v108_v3 = vshrl.u32 %v107_v2, 7  ;;  %v337_v4 = vand.u32 127, %v107_v2 }
  0x11   :  { %245 = vmatprep.subr.msk.mxu0 %vm25_vm0, %v23_v1 }
  0x12   :  { %v109_v5 = vadd.s32 8, %v108_v3  ;;  %vm112_vm2 = vcmp.eq.s32.totalorder %v108_v3, %v337_v4  ;;  %vm198_vm4 = vcmp.lt.s32.totalorder %v337_v4, 8 }
  0x13   :  { %vm199_vm6 = vmxor %vm321_vm5, %vm198_vm4 }
  0x14   :  { %246 = vmatpush3.xpose.msk.msra.mxu0 %vm25_vm0, %v23_v1  ;;  %vm113_vm1 = vcmp.eq.s32.totalorder %v109_v5, %v337_v4  ;;  %vm201_vm7 = vmxor %vm199_vm6, %vm321_vm5 }
  0x15   :  { %vm202_vm8 = vmxor %vm198_vm4, %vm321_vm5 }
  0x17   :  { %248 = vmatmul.mubr.msk.f32.vlgmr.msra.gmra.mxu0 %vm25_vm0, %v24_v0 }
  0xd7   :  { %v249_v6 = vpop.f32.mrf.mxu0 }
  0xd8   :  { %v115_v7 = vsel %vm113_vm1, %v249_v6, 0.0  ;;  %v133_v24 = vmul.f32 2.0, %v249_v6 }
  0xd9   :  { %v98_v8 = vpop.f32.mrf.mxu0  ;;  %v120_v11 = vsel %vm116_vm3, %v115_v7, 0.0 }
  0xda   :  { %v114_v9 = vsel %vm112_vm2, %v98_v8, 0.0  ;;  %v132_v20 = vmul.f32 2.0, %v98_v8 }
  0xdb   :  { %v117_v10 = vsel %vm116_vm3, %v114_v9, 0.0 }
  0xdc   :  { %118 = vadd.xlane.f32.xlu0 %v117_v10  ;;  %v123_v12 = vadd.f32 %v120_v11, %v117_v10 }
  0xde   :  { %v124_v13 = vrot.slane %v123_v12, 4 }
  0xe0   :  { %121 = vadd.xlane.f32.xlu0 %v120_v11  ;;  %v125_v14 = vadd.f32 %v124_v13, %v123_v12 }
  0xe2   :  { %v126_v15 = vrot.slane %v125_v14, 2 }
  0xe4   :  { %v127_v16 = vadd.f32 %v126_v15, %v125_v14 }
  0xe6   :  { %v128_v17 = vrot.slane %v127_v16, 1 }
  0xe8   :  { %v129_v18 = vadd.f32 %v128_v17, %v127_v16 }
 0x165   :  { %v119_v19 = vpop.xlane.xlu0 %118 }
 0x166   :  { %v130_v21 = vadd.f32 %v129_v18, %v119_v19  ;;  %v322_v19 = vmov -0.015625  }
 0x168   :  { %v134_v22 = vsub.f32 %v130_v21, %v132_v20  ;;  %v203_v20 = vsel %vm201_vm7, 0.017857144, %v322_v19 }
 0x169   :  { %v122_v23 = vpop.xlane.xlu0 %121 }
 0x16a   :  { %v136_v25 = vmax.f32 %v134_v22, 0.0  ;;  %v131_v26 = vadd.f32 %v129_v18, %v122_v23  ;;  %v204_v23 = vsel %vm202_vm8, 0.017857144, %v322_v19 }
 0x16c   :  { %v138_v27 = vsel %vm112_vm2, 1e+30, %v136_v25  ;;  %v135_v28 = vsub.f32 %v131_v26, %v133_v24 }
 0x16d   :  { %v140_v29 = vadd.f32 6.4, %v138_v27  ;;  %v148_v30 = vadd.f32 12.8, %v138_v27  ;;  %v156_v31 = vadd.f32 32.0, %v138_v27  ;;  %v164_v33 = vadd.f32 64.0, %v138_v27 }
 0x16e   :  { %v137_v32 = vmax.f32 %v135_v28, 0.0  ;;  %v172_v39 = vadd.f32 128.0, %v138_v27  ;;  %v180_v41 = vadd.f32 320.0, %v138_v27  ;;  %v188_v43 = vadd.f32 640.0, %v138_v27 }
 0x16f   :  { %258 = vrcp.f32 %v140_v29 }
 0x170   :  { %260 = vrcp.f32 %v148_v30  ;;  %v139_v34 = vsel %vm113_vm1, 1e+30, %v137_v32 }
 0x171   :  { %262 = vrcp.f32 %v156_v31  ;;  %v141_v35 = vadd.f32 6.4, %v139_v34  ;;  %v149_v36 = vadd.f32 12.8, %v139_v34  ;;  %v157_v37 = vadd.f32 32.0, %v139_v34 }
 0x172   :  { %v165_v38 = vadd.f32 64.0, %v139_v34  ;;  %264 = vrcp.f32 %v164_v33  ;;  %v173_v40 = vadd.f32 128.0, %v139_v34  ;;  %v181_v42 = vadd.f32 320.0, %v139_v34 }
 0x173   :  { %266 = vrcp.f32 %v141_v35  ;;  %v189_v44 = vadd.f32 640.0, %v139_v34 }
 0x174   :  { %268 = vrcp.f32 %v149_v36 }
 0x175   :  { %270 = vrcp.f32 %v157_v37 }
 0x176   :  { %272 = vrcp.f32 %v165_v38 }
 0x177   :  { %274 = vrcp.f32 %v172_v39 }
 0x178   :  { %276 = vrcp.f32 %v173_v40 }
 0x179   :  { %278 = vrcp.f32 %v180_v41 }
 0x17a   :  { %280 = vrcp.f32 %v181_v42 }
 0x17b   :  { %282 = vrcp.f32 %v188_v43 }
 0x17c   :  { %v259_v45 = vpop.eup %258  ;;  %284 = vrcp.f32 %v189_v44 }
 0x17d   :  { %v261_v46 = vpop.eup %260  ;;  %v144_v47 = vmul.f32 6.4, %v259_v45 }
 0x17e   :  { %v263_v48 = vpop.eup %262  ;;  %v152_v49 = vmul.f32 12.8, %v261_v46 }
 0x17f   :  { %v265_v50 = vpop.eup %264  ;;  %v160_v53 = vmul.f32 32.0, %v263_v48 }
 0x180   :  { %v267_v51 = vpop.eup %266  ;;  %v154_v52 = vadd.f32 %v152_v49, %v144_v47  ;;  %v168_v59 = vmul.f32 64.0, %v265_v50 }
 0x181   :  { %v269_v54 = vpop.eup %268  ;;  %v145_v55 = vmul.f32 6.4, %v267_v51 }
 0x182   :  { %v271_v56 = vpop.eup %270  ;;  %v153_v57 = vmul.f32 12.8, %v269_v54  ;;  %v162_v58 = vadd.f32 %v160_v53, %v154_v52 }
 0x183   :  { %v273_v60 = vpop.eup %272  ;;  %v161_v63 = vmul.f32 32.0, %v271_v56 }
 0x184   :  { %v275_v61 = vpop.eup %274  ;;  %v155_v62 = vadd.f32 %v153_v57, %v145_v55  ;;  %v170_v0 = vadd.f32 %v168_v59, %v162_v58  ;;  %v169_v6 = vmul.f32 64.0, %v273_v60 }
 0x185   :  { %v277_v1 = vpop.eup %276  ;;  %v176_v2 = vmul.f32 128.0, %v275_v61 }
 0x186   :  { %v279_v3 = vpop.eup %278  ;;  %v163_v5 = vadd.f32 %v161_v63, %v155_v62  ;;  %v177_v12 = vmul.f32 128.0, %v277_v1 }
 0x187   :  { %v281_v7 = vpop.eup %280  ;;  %v178_v8 = vadd.f32 %v176_v2, %v170_v0  ;;  %v184_v9 = vmul.f32 320.0, %v279_v3 }
 0x188   :  { %v283_v10 = vpop.eup %282  ;;  %v171_v11 = vadd.f32 %v169_v6, %v163_v5  ;;  %v185_v17 = vmul.f32 320.0, %v281_v7 }
 0x189   :  { %v285_v13 = vpop.eup %284  ;;  %v186_v14 = vadd.f32 %v184_v9, %v178_v8  ;;  %v192_v15 = vmul.f32 640.0, %v283_v10 }
 0x18a   :  { %v179_v16 = vadd.f32 %v177_v12, %v171_v11  ;;  %v193_v22 = vmul.f32 640.0, %v285_v13 }
 0x18b   :  { %v194_v18 = vadd.f32 %v192_v15, %v186_v14 }
 0x18c   :  { %v187_v21 = vadd.f32 %v185_v17, %v179_v16 }
 0x18d   :  { %v205_v25 = vmul.f32 %v203_v20, %v194_v18 }
 0x18e   :  { %v195_v24 = vadd.f32 %v193_v22, %v187_v21 }
 0x18f   :  { %v207_v27 = vsel %vm116_vm3, %v205_v25, 0.0 }
 0x190   :  { %v206_v26 = vmul.f32 %v204_v23, %v195_v24 }
 0x192   :  { %v208_v28 = vsel %vm116_vm3, %v206_v26, 0.0 }
 0x193   :  { %v209_v29 = vadd.f32 %v208_v28, %v207_v27 }
 0x195   :  { %210 = vadd.xlane.f32.xlu1 %v209_v29 }
 0x21e   :  { %v211_v30 = vpop.xlane.xlu1 %210 }
 0x21f   :  { %v212_v31 = vrot.slane %v211_v30, 4 }
 0x221   :  { %v213_v32 = vadd.f32 %v212_v31, %v211_v30 }
 0x223   :  { %v214_v4 = vrot.slane %v213_v32, 2 }
 0x225   :  { %v215_v33 = vadd.f32 %v214_v4, %v213_v32 }
 0x227   :  { %v216_v34 = vrot.slane %v215_v33, 1 }
 0x229   :  { %v217_v35 = vadd.f32 %v216_v34, %v215_v33 }
 0x22b   :  { %250 = vpush %v217_v35 }
 0x25c   :  { %s251_s0 = spop %250 }
 0x25d   :  { %220 = sst [smem:[#allocation5]] %s251_s0 }
 0x25e   :  { %228 = dma.smem_to_hbm %s323_s13, 16, %s365_s1, [#allocation4]  }
 0x25f   :  { %316 = dma.done.wait [#allocation4], 16  }
 0x260   :  { %317 = vsyncadd [#allocation4], 4294967280 }
 0x261   :  { %232 = sfence }
 0x262   :  { %233 = vsyncpa [#allocation3], 1 }
 0x263   :  { %234 = vsyncpa [#allocation4], 1 }

</bundles_post_ra>
